<compile_context>
chip_gen: v6e
topology: v6e:2x2x1
jax: 0.10.0
libtpu: 0.0.40
codegen_flags: <defaults>
</compile_context>

<pallas_src>
import functools

import jax
import jax.numpy as jnp
from jax import lax
from jax.experimental import pallas as pl
from jax.experimental.pallas import tpu as pltpu


def _round_up(x, m):
    return ((x + m - 1) // m) * m


def _vmem_capacity_bytes():
    """Per-TensorCore VMEM capacity; conservative fallback if unqueryable."""
    try:
        return int(pltpu.get_tpu_info().vmem_capacity_bytes)
    except Exception:
        return 64 * 1024 * 1024  # v7x per-TC size = most conservative guess


def _lp_fused_kernel(adjT_ref, res_ref, y0_ref, o_ref, *, num_layers, unroll):
    """All propagation layers, VMEM-resident, nodes on the lane axis.

    adjT_ref : (Np, Np) adj dtype (bf16 by default), == (alpha * adj)^T
    res_ref  : (Cp, Np) f32, residual term (transposed + zero-padded)
    y0_ref   : (Cp, Np) state dtype, initial (masked) labels (transposed)
    o_ref    : (Cp, Np) state dtype; doubles as the evolving state buffer
    """
    o_ref[...] = y0_ref[...]

    def one_layer():
        # (Cp, Np) @ (Np, Np) on the MXU with f32 accumulation; add residual,
        # clip to [0, 1], store back in the (possibly bf16) state dtype.
        acc = jnp.dot(o_ref[...], adjT_ref[...],
                      preferred_element_type=jnp.float32)
        o_ref[...] = jnp.clip(acc + res_ref[...], 0.0, 1.0).astype(o_ref.dtype)

    n_loop, rem = divmod(num_layers, unroll)

    def body(_, carry):
        # Manual partial unroll: the LLO scheduler sees `unroll` layers at
        # once and can overlap epilogue VALU work with the next matmul.
        for _ in range(unroll):
            one_layer()
        return carry

    lax.fori_loop(0, n_loop, body, 0)
    for _ in range(rem):
        one_layer()


def label_propagation(y, adj, mask=None, *, num_layers=50, alpha=0.5,
                      residual=True, num_classes=None,
                      adj_dtype=jnp.bfloat16, unroll=4):
    """JAX/Pallas equivalent of LabelPropagation.forward."""
    # --- glue: one-hot integer labels (matches F.one_hot(...).float()) -----
    if jnp.issubdtype(y.dtype, jnp.integer):
        if num_classes is None:
            try:
                num_classes = int(jnp.max(y)) + 1
            except Exception as e:  # traced under jit -> cannot peek at data
                raise ValueError(
                    "num_classes must be passed explicitly when y is traced "
                    "(e.g. under jit).") from e
        y = jax.nn.one_hot(y.reshape(-1), num_classes, dtype=jnp.float32)
    else:
        y = y.astype(jnp.float32)

    N, C = y.shape
    assert adj.shape == (N, N), "adj must be (N, N) dense"

    out0 = y if mask is None else jnp.where(mask[:, None], y, 0.0)
    res = (1.0 - alpha) * out0 if residual else out0

    use_bf16 = jnp.dtype(adj_dtype) == jnp.dtype(jnp.bfloat16)
    state_dtype = jnp.bfloat16 if use_bf16 else jnp.float32

    # --- pad: nodes -> lane axis (multiple of 256, full MXU output width),
    #          classes -> sublane axis (multiple of 16).  Zero pad is exact.
    Np = _round_up(N, 256)
    Cp = _round_up(max(C, 1), 16)

    # Fold alpha into adj in f32 BEFORE the low-precision cast, transpose,
    # then pad directly in the target dtype (no (Np,Np) f32 intermediate).
    adjT = (alpha * adj.astype(jnp.float32)).astype(adj_dtype).T
    adjT_p = jnp.pad(adjT, ((0, Np - N), (0, Np - N)))

    y0_p = jnp.pad(out0.T.astype(state_dtype), ((0, Cp - C), (0, Np - N)))
    res_p = jnp.pad(res.T.astype(jnp.float32), ((0, Cp - C), (0, Np - N)))

    # --- VMEM budget (generation-aware): adjT + y0 + out (state) + res (f32)
    adj_bytes = jnp.dtype(adj_dtype).itemsize
    st_bytes = jnp.dtype(state_dtype).itemsize
    vmem_needed = Np * Np * adj_bytes + Cp * Np * (2 * st_bytes + 4)
    vmem_cap = _vmem_capacity_bytes()
    budget = int(0.80 * vmem_cap)  # leave ~20% for Mosaic internal scratch
    if vmem_needed > budget:
        # TODO(synk): add an HBM-streaming tiled fallback (emit_pipeline over
        # row tiles of adjT per layer) for adjacencies that don't fit VMEM,
        # and a 2-TensorCore row split of adjT (core_map + per-layer state
        # exchange) to use both cores on v7x.
        raise NotImplementedError(
            f"adjacency too large for the fully VMEM-resident fused kernel "
            f"({vmem_needed} B needed, {budget} B usable of {vmem_cap} B)")
    vmem_limit = max(32 * 1024 * 1024,
                     min(vmem_needed + 16 * 1024 * 1024, int(0.95 * vmem_cap)))

    eff_unroll = max(1, min(int(unroll), max(num_layers, 1)))
    kernel = functools.partial(_lp_fused_kernel, num_layers=num_layers,
                               unroll=eff_unroll)
    out_p = pl.pallas_call(
        kernel,
        out_shape=jax.ShapeDtypeStruct((Cp, Np), state_dtype),
        in_specs=[
            pl.BlockSpec(memory_space=pltpu.MemorySpace.VMEM),  # adjT (alpha-scaled)
            pl.BlockSpec(memory_space=pltpu.MemorySpace.VMEM),  # residual (f32)
            pl.BlockSpec(memory_space=pltpu.MemorySpace.VMEM),  # initial labels
        ],
        out_specs=pl.BlockSpec(memory_space=pltpu.MemorySpace.VMEM),
        input_output_aliases={2: 0},  # donate the y0 HBM buffer to the output
        compiler_params=pltpu.CompilerParams(
            vmem_limit_bytes=int(vmem_limit)),
    )(adjT_p, res_p, y0_p)

    # TODO(synk): on v5e, stream the first layer's adj tiles so compute
    # overlaps the initial whole-array HBM->VMEM load for short num_layers.
    return out_p[:C, :N].T.astype(jnp.float32)


def _label_propagation_ref(y_onehot, adj, mask, *, num_layers, alpha,
                           residual):
    """Pure-JAX f32 reference for correctness checking."""
    out = jnp.where(mask[:, None], y_onehot, 0.0) if mask is not None else y_onehot
    res = (1.0 - alpha) * out if residual else out
    for _ in range(num_layers):
        out = jnp.clip(alpha * (adj @ out) + res, 0.0, 1.0)
    return out


if __name__ == "__main__":
    key = jax.random.PRNGKey(0)
    k_adj, k_y, k_mask = jax.random.split(key, 3)

    N, C = 256, 16  # small node count, 16 classes

    # Deterministic random symmetric adjacency, symmetrically normalized.
    a = (jax.random.uniform(k_adj, (N, N)) < 0.05).astype(jnp.float32)
    a = jnp.maximum(a, a.T)
    a = a + jnp.eye(N, dtype=jnp.float32)
    deg = jnp.sum(a, axis=1)
    d_inv_sqrt = 1.0 / jnp.sqrt(deg)
    adj = a * d_inv_sqrt[:, None] * d_inv_sqrt[None, :]

    # Integer labels (torch.long path -> one-hot) and a boolean train mask.
    y = jax.random.randint(k_y, (N,), 0, C, dtype=jnp.int32)
    y = y.at[:C].set(jnp.arange(C, dtype=jnp.int32))  # every class present
    mask = jax.random.uniform(k_mask, (N,)) < 0.3

    out = label_propagation(y, adj, mask, num_layers=50, alpha=0.5,
                            residual=True, num_classes=C)
    out = jax.block_until_ready(out)

    # Sanity: shape, value range, and agreement with a pure-JAX f32 reference
    # (bf16 adjacency/state introduce only small, alpha-damped rounding error).
    assert out.shape == (N, C)
    assert bool(jnp.all(out >= 0.0)) and bool(jnp.all(out <= 1.0))
    ref = _label_propagation_ref(
        jax.nn.one_hot(y, C, dtype=jnp.float32), adj, mask,
        num_layers=50, alpha=0.5, residual=True)
    max_err = float(jnp.max(jnp.abs(out - ref)))
    assert max_err < 0.06, f"max |err| vs f32 reference too large: {max_err}"

    print("KERNEL_OK")
</pallas_src>

<mosaic_0001>
module attributes {stable_mosaic.version = 11 : i64} {
  func.func @_lp_fused_kernel(%arg0: memref<256x256xbf16, #tpu.memory_space<vmem>>, %arg1: memref<16x256xf32, #tpu.memory_space<vmem>>, %arg2: memref<16x256xbf16, #tpu.memory_space<vmem>>, %arg3: memref<16x256xbf16, #tpu.memory_space<vmem>>) attributes {dimension_semantics = [], scalar_prefetch = 0 : i64, scratch_operands = 0 : i64, tpu.core_type = #tpu.core_type<tc>} {
    %c0 = arith.constant 0 : index
    %c0_0 = arith.constant 0 : index
    %0 = vector.load %arg2[%c0, %c0_0] : memref<16x256xbf16, #tpu.memory_space<vmem>>, vector<16x256xbf16>
    %c0_1 = arith.constant 0 : index
    %c0_2 = arith.constant 0 : index
    %1 = vector.load %arg3[%c0_1, %c0_2] : memref<16x256xbf16, #tpu.memory_space<vmem>>, vector<16x256xbf16>
    tpu.vector_store %arg3[%c0_1, %c0_2], %0 {strides = array<i32>} : memref<16x256xbf16, #tpu.memory_space<vmem>>, vector<16x256xbf16>,
    %c0_i32 = arith.constant 0 : i32
    %c12_i32 = arith.constant 12 : i32
    %2 = arith.addi %c0_i32, %c12_i32 : i32
    %c1_i32 = arith.constant 1 : i32
    scf.for %arg4 = %c0_i32 to %2 step %c1_i32  : i32 {
      %c0_24 = arith.constant 0 : index
      %c0_25 = arith.constant 0 : index
      %25 = vector.load %arg3[%c0_24, %c0_25] : memref<16x256xbf16, #tpu.memory_space<vmem>>, vector<16x256xbf16>
      %c0_26 = arith.constant 0 : index
      %c0_27 = arith.constant 0 : index
      %26 = vector.load %arg0[%c0_26, %c0_27] : memref<256x256xbf16, #tpu.memory_space<vmem>>, vector<256x256xbf16>
      %cst_28 = arith.constant dense<0.000000e+00> : vector<16x256xf32>
      %27 = tpu.matmul %25, %26, %cst_28 {dimension_numbers = #tpu.dot_dimension_numbers<[1], [0], [0], [1], [0, 0, 1, 1], [], []>} : vector<16x256xbf16>, vector<256x256xbf16>, vector<16x256xf32> -> vector<16x256xf32>
      %c0_29 = arith.constant 0 : index
      %c0_30 = arith.constant 0 : index
      %28 = vector.load %arg1[%c0_29, %c0_30] : memref<16x256xf32, #tpu.memory_space<vmem>>, vector<16x256xf32>
      %29 = arith.addf %27, %28 : vector<16x256xf32>
      %cst_31 = arith.constant 0.000000e+00 : f32
      %cst_32 = arith.constant 1.000000e+00 : f32
      %30 = vector.broadcast %cst_31 : f32 to vector<16x256xf32>
      %31 = arith.maximumf %30, %29 : vector<16x256xf32>
      %32 = vector.broadcast %cst_32 : f32 to vector<16x256xf32>
      %33 = arith.minimumf %32, %31 : vector<16x256xf32>
      %34 = arith.truncf %33 : vector<16x256xf32> to vector<16x256xbf16>
      %c0_33 = arith.constant 0 : index
      %c0_34 = arith.constant 0 : index
      %35 = vector.load %arg3[%c0_33, %c0_34] : memref<16x256xbf16, #tpu.memory_space<vmem>>, vector<16x256xbf16>
      tpu.vector_store %arg3[%c0_33, %c0_34], %34 {strides = array<i32>} : memref<16x256xbf16, #tpu.memory_space<vmem>>, vector<16x256xbf16>,
      %c0_35 = arith.constant 0 : index
      %c0_36 = arith.constant 0 : index
      %36 = vector.load %arg3[%c0_35, %c0_36] : memref<16x256xbf16, #tpu.memory_space<vmem>>, vector<16x256xbf16>
      %c0_37 = arith.constant 0 : index
      %c0_38 = arith.constant 0 : index
      %37 = vector.load %arg0[%c0_37, %c0_38] : memref<256x256xbf16, #tpu.memory_space<vmem>>, vector<256x256xbf16>
      %cst_39 = arith.constant dense<0.000000e+00> : vector<16x256xf32>
      %38 = tpu.matmul %36, %37, %cst_39 {dimension_numbers = #tpu.dot_dimension_numbers<[1], [0], [0], [1], [0, 0, 1, 1], [], []>} : vector<16x256xbf16>, vector<256x256xbf16>, vector<16x256xf32> -> vector<16x256xf32>
      %c0_40 = arith.constant 0 : index
      %c0_41 = arith.constant 0 : index
      %39 = vector.load %arg1[%c0_40, %c0_41] : memref<16x256xf32, #tpu.memory_space<vmem>>, vector<16x256xf32>
      %40 = arith.addf %38, %39 : vector<16x256xf32>
      %cst_42 = arith.constant 0.000000e+00 : f32
      %cst_43 = arith.constant 1.000000e+00 : f32
      %41 = vector.broadcast %cst_42 : f32 to vector<16x256xf32>
      %42 = arith.maximumf %41, %40 : vector<16x256xf32>
      %43 = vector.broadcast %cst_43 : f32 to vector<16x256xf32>
      %44 = arith.minimumf %43, %42 : vector<16x256xf32>
      %45 = arith.truncf %44 : vector<16x256xf32> to vector<16x256xbf16>
      %c0_44 = arith.constant 0 : index
      %c0_45 = arith.constant 0 : index
      %46 = vector.load %arg3[%c0_44, %c0_45] : memref<16x256xbf16, #tpu.memory_space<vmem>>, vector<16x256xbf16>
      tpu.vector_store %arg3[%c0_44, %c0_45], %45 {strides = array<i32>} : memref<16x256xbf16, #tpu.memory_space<vmem>>, vector<16x256xbf16>,
      %c0_46 = arith.constant 0 : index
      %c0_47 = arith.constant 0 : index
      %47 = vector.load %arg3[%c0_46, %c0_47] : memref<16x256xbf16, #tpu.memory_space<vmem>>, vector<16x256xbf16>
      %c0_48 = arith.constant 0 : index
      %c0_49 = arith.constant 0 : index
      %48 = vector.load %arg0[%c0_48, %c0_49] : memref<256x256xbf16, #tpu.memory_space<vmem>>, vector<256x256xbf16>
      %cst_50 = arith.constant dense<0.000000e+00> : vector<16x256xf32>
      %49 = tpu.matmul %47, %48, %cst_50 {dimension_numbers = #tpu.dot_dimension_numbers<[1], [0], [0], [1], [0, 0, 1, 1], [], []>} : vector<16x256xbf16>, vector<256x256xbf16>, vector<16x256xf32> -> vector<16x256xf32>
      %c0_51 = arith.constant 0 : index
      %c0_52 = arith.constant 0 : index
      %50 = vector.load %arg1[%c0_51, %c0_52] : memref<16x256xf32, #tpu.memory_space<vmem>>, vector<16x256xf32>
      %51 = arith.addf %49, %50 : vector<16x256xf32>
      %cst_53 = arith.constant 0.000000e+00 : f32
      %cst_54 = arith.constant 1.000000e+00 : f32
      %52 = vector.broadcast %cst_53 : f32 to vector<16x256xf32>
      %53 = arith.maximumf %52, %51 : vector<16x256xf32>
      %54 = vector.broadcast %cst_54 : f32 to vector<16x256xf32>
      %55 = arith.minimumf %54, %53 : vector<16x256xf32>
      %56 = arith.truncf %55 : vector<16x256xf32> to vector<16x256xbf16>
      %c0_55 = arith.constant 0 : index
      %c0_56 = arith.constant 0 : index
      %57 = vector.load %arg3[%c0_55, %c0_56] : memref<16x256xbf16, #tpu.memory_space<vmem>>, vector<16x256xbf16>
      tpu.vector_store %arg3[%c0_55, %c0_56], %56 {strides = array<i32>} : memref<16x256xbf16, #tpu.memory_space<vmem>>, vector<16x256xbf16>,
      %c0_57 = arith.constant 0 : index
      %c0_58 = arith.constant 0 : index
      %58 = vector.load %arg3[%c0_57, %c0_58] : memref<16x256xbf16, #tpu.memory_space<vmem>>, vector<16x256xbf16>
      %c0_59 = arith.constant 0 : index
      %c0_60 = arith.constant 0 : index
      %59 = vector.load %arg0[%c0_59, %c0_60] : memref<256x256xbf16, #tpu.memory_space<vmem>>, vector<256x256xbf16>
      %cst_61 = arith.constant dense<0.000000e+00> : vector<16x256xf32>
      %60 = tpu.matmul %58, %59, %cst_61 {dimension_numbers = #tpu.dot_dimension_numbers<[1], [0], [0], [1], [0, 0, 1, 1], [], []>} : vector<16x256xbf16>, vector<256x256xbf16>, vector<16x256xf32> -> vector<16x256xf32>
      %c0_62 = arith.constant 0 : index
      %c0_63 = arith.constant 0 : index
      %61 = vector.load %arg1[%c0_62, %c0_63] : memref<16x256xf32, #tpu.memory_space<vmem>>, vector<16x256xf32>
      %62 = arith.addf %60, %61 : vector<16x256xf32>
      %cst_64 = arith.constant 0.000000e+00 : f32
      %cst_65 = arith.constant 1.000000e+00 : f32
      %63 = vector.broadcast %cst_64 : f32 to vector<16x256xf32>
      %64 = arith.maximumf %63, %62 : vector<16x256xf32>
      %65 = vector.broadcast %cst_65 : f32 to vector<16x256xf32>
      %66 = arith.minimumf %65, %64 : vector<16x256xf32>
      %67 = arith.truncf %66 : vector<16x256xf32> to vector<16x256xbf16>
      %c0_66 = arith.constant 0 : index
      %c0_67 = arith.constant 0 : index
      %68 = vector.load %arg3[%c0_66, %c0_67] : memref<16x256xbf16, #tpu.memory_space<vmem>>, vector<16x256xbf16>
      tpu.vector_store %arg3[%c0_66, %c0_67], %67 {strides = array<i32>} : memref<16x256xbf16, #tpu.memory_space<vmem>>, vector<16x256xbf16>,
    }
    %c0_3 = arith.constant 0 : index
    %c0_4 = arith.constant 0 : index
    %3 = vector.load %arg3[%c0_3, %c0_4] : memref<16x256xbf16, #tpu.memory_space<vmem>>, vector<16x256xbf16>
    %c0_5 = arith.constant 0 : index
    %c0_6 = arith.constant 0 : index
    %4 = vector.load %arg0[%c0_5, %c0_6] : memref<256x256xbf16, #tpu.memory_space<vmem>>, vector<256x256xbf16>
    %cst = arith.constant dense<0.000000e+00> : vector<16x256xf32>
    %5 = tpu.matmul %3, %4, %cst {dimension_numbers = #tpu.dot_dimension_numbers<[1], [0], [0], [1], [0, 0, 1, 1], [], []>} : vector<16x256xbf16>, vector<256x256xbf16>, vector<16x256xf32> -> vector<16x256xf32>
    %c0_7 = arith.constant 0 : index
    %c0_8 = arith.constant 0 : index
    %6 = vector.load %arg1[%c0_7, %c0_8] : memref<16x256xf32, #tpu.memory_space<vmem>>, vector<16x256xf32>
    %7 = arith.addf %5, %6 : vector<16x256xf32>
    %cst_9 = arith.constant 0.000000e+00 : f32
    %cst_10 = arith.constant 1.000000e+00 : f32
    %8 = vector.broadcast %cst_9 : f32 to vector<16x256xf32>
    %9 = arith.maximumf %8, %7 : vector<16x256xf32>
    %10 = vector.broadcast %cst_10 : f32 to vector<16x256xf32>
    %11 = arith.minimumf %10, %9 : vector<16x256xf32>
    %12 = arith.truncf %11 : vector<16x256xf32> to vector<16x256xbf16>
    %c0_11 = arith.constant 0 : index
    %c0_12 = arith.constant 0 : index
    %13 = vector.load %arg3[%c0_11, %c0_12] : memref<16x256xbf16, #tpu.memory_space<vmem>>, vector<16x256xbf16>
    tpu.vector_store %arg3[%c0_11, %c0_12], %12 {strides = array<i32>} : memref<16x256xbf16, #tpu.memory_space<vmem>>, vector<16x256xbf16>,
    %c0_13 = arith.constant 0 : index
    %c0_14 = arith.constant 0 : index
    %14 = vector.load %arg3[%c0_13, %c0_14] : memref<16x256xbf16, #tpu.memory_space<vmem>>, vector<16x256xbf16>
    %c0_15 = arith.constant 0 : index
    %c0_16 = arith.constant 0 : index
    %15 = vector.load %arg0[%c0_15, %c0_16] : memref<256x256xbf16, #tpu.memory_space<vmem>>, vector<256x256xbf16>
    %cst_17 = arith.constant dense<0.000000e+00> : vector<16x256xf32>
    %16 = tpu.matmul %14, %15, %cst_17 {dimension_numbers = #tpu.dot_dimension_numbers<[1], [0], [0], [1], [0, 0, 1, 1], [], []>} : vector<16x256xbf16>, vector<256x256xbf16>, vector<16x256xf32> -> vector<16x256xf32>
    %c0_18 = arith.constant 0 : index
    %c0_19 = arith.constant 0 : index
    %17 = vector.load %arg1[%c0_18, %c0_19] : memref<16x256xf32, #tpu.memory_space<vmem>>, vector<16x256xf32>
    %18 = arith.addf %16, %17 : vector<16x256xf32>
    %cst_20 = arith.constant 0.000000e+00 : f32
    %cst_21 = arith.constant 1.000000e+00 : f32
    %19 = vector.broadcast %cst_20 : f32 to vector<16x256xf32>
    %20 = arith.maximumf %19, %18 : vector<16x256xf32>
    %21 = vector.broadcast %cst_21 : f32 to vector<16x256xf32>
    %22 = arith.minimumf %21, %20 : vector<16x256xf32>
    %23 = arith.truncf %22 : vector<16x256xf32> to vector<16x256xbf16>
    %c0_22 = arith.constant 0 : index
    %c0_23 = arith.constant 0 : index
    %24 = vector.load %arg3[%c0_22, %c0_23] : memref<16x256xbf16, #tpu.memory_space<vmem>>, vector<16x256xbf16>
    tpu.vector_store %arg3[%c0_22, %c0_23], %23 {strides = array<i32>} : memref<16x256xbf16, #tpu.memory_space<vmem>>, vector<16x256xbf16>,
    return
  }
}

</mosaic_0001>

<bundles_post_ra>
// kernel: tpu_custom_call.1
= control target key start
LH: loop header
LB: loop body
LE: loop exit
PB: predicated region body
PF: predicated region fallthrough
CT: control target
= control target key end

     0   :  { %8 = vsyncpa [#allocation3], 0  ;;  %s2430_s0 = inlined_call_operand.hbm [shape: bf16[256,256], index: 0, kind: input, shape index: {}]   ;;  %s2431_s1 = inlined_call_operand.vmem [shape: f32[16,256], index: 1, kind: input, shape index: {}]   ;;  %s2432_s2 = inlined_call_operand.hbm [shape: bf16[16,256], index: 2, kind: input, shape index: {}, may-alias: {2,3}]   ;;  %s2433_s3 = inlined_call_operand.hbm [shape: bf16[16,256], index: 3, kind: output, shape index: {}, may-alias: {2,3}]  }
   0x1   :  { %9 = vsyncpa [#allocation6], 0 }
   0x2   :  { %10 = vsyncpa [#allocation4], 0  ;;  %s2139_s12 = smov [#allocation2]  }
   0x3   :  { %s16_s13 = sshll.u32 %s2139_s12, 4  ;;  %s17_s13 = int_to_ptr.vmem [resolvable:$true] %s16_s13 }
   0x4   :  { %s2073_s14 = scalar_lea.vmem %s17_s13, 4096  ;;  %p2078_p1 = scmp.lt.s32.totalorder %s17_s13, %s17_s13 }
   0x5   :  { %p2074_p0 = scmp.ne.s32.totalorder %s17_s13, %s2073_s14  ;;  %p2079_p2 = scmp.lt.s32.totalorder %s2073_s14, %s2073_s14 }
   0x7   :  { %p2080_p3 = por %p2079_p2, %p2078_p1 }
   0x9   :  { %p2081_p4 = pnand %p2080_p3, %p2074_p0 }
   0xb   :  { %2084 = shalt.err (!%p2081_p4)
}
   0xc   :  { %s2140_s15 = smov 128   ;;  %s2141_s16 = smov 8  }
   0xd   :  { %22 = dma.hbm_to_vmem [thread:$0]  %s2430_s0, 4096, %s17_s13, [#allocation3], %s2140_s15, %s2140_s15, %s2141_s16  }
   0xe   :  { %s2142_s19 = smov [#allocation5]  }
   0xf   :  { %s30_s20 = sshll.u32 %s2142_s19, 4  ;;  %s31_s20 = int_to_ptr.vmem [resolvable:$true] %s30_s20 }
  0x10   :  { %s2093_s21 = scalar_lea.vmem %s31_s20, 256  ;;  %p2098_p6 = scmp.lt.s32.totalorder %s31_s20, %s31_s20 }
  0x11   :  { %p2094_p5 = scmp.ne.s32.totalorder %s31_s20, %s2093_s21  ;;  %p2099_p7 = scmp.lt.s32.totalorder %s2093_s21, %s2093_s21 }
  0x13   :  { %p2100_p8 = por %p2099_p7, %p2098_p6 }
  0x15   :  { %p2101_p9 = pnand %p2100_p8, %p2094_p5 }
  0x17   :  { %2104 = shalt.err (!%p2101_p9)
}
  0x18   :  { %36 = dma.hbm_to_vmem [thread:$0]  %s2432_s2, 256, %s31_s20, [#allocation6], %s2140_s15, %s2140_s15, %s2141_s16  }
  0x19   :  { %2129 = dma.done.wait [#allocation3], 4096  }
  0x1a   :  { %2130 = vsyncadd [#allocation3], 4294963200 }
  0x1b   :  { %2131 = dma.done.wait [#allocation6], 256  }
  0x1c   :  { %2132 = vsyncadd [#allocation6], 4294967040  ;;  %v43_v0 = vld [vmem:[#allocation5] sm:$0xff]  ;;  %v44_v1 = vld [vmem:[#allocation5 + $0x8] sm:$0xff]  ;;  %s2176_s0 = smov 0  }
  0x1d   :  { %45 = vst [vmem:[#allocation7] sm:$0xff] %v43_v0  ;;  %46 = vst [vmem:[#allocation7 + $0x8] sm:$0xff] %v44_v1 }
  0x1e LB: > { %v2181_v2 = vld [vmem:[#allocation2 + $0x74] ss:$8 sps:$4 sm:$0xff]   ;;  %v2183_v3 = vld [vmem:[#allocation2 + $0x70] ss:$8 sps:$4 sm:$0xff]   ;;  %v2186_v4 = vld [vmem:[#allocation2 + $0x64] ss:$8 sps:$4 sm:$0xff]   ;;  %s2137_s0 = sphi %s2176_s0, %s52_s0  }
  0x1f   : > { %261 = vmatprep.subr.bf16.mxu0 %v2181_v2  ;;  %534 = vmatprep.subr.bf16.mxu1 %v2181_v2  ;;  %v2190_v5 = vld [vmem:[#allocation2 + $0x60] ss:$8 sps:$4 sm:$0xff]   ;;  %v2194_v6 = vld [vmem:[#allocation2 + $0x54] ss:$8 sps:$4 sm:$0xff]   ;;  %v2198_v7 = vld [vmem:[#allocation2 + $0x50] ss:$8 sps:$4 sm:$0xff]  }
  0x20   : > { %262 = vmatpush1.bf16.msra.mxu0 %v2183_v3  ;;  %535 = vmatpush1.bf16.msra.mxu1 %v2183_v3  ;;  %v2202_v8 = vld [vmem:[#allocation2 + $0x44] ss:$8 sps:$4 sm:$0xff]   ;;  %v2206_v9 = vld [vmem:[#allocation2 + $0x40] ss:$8 sps:$4 sm:$0xff]   ;;  %v2210_v10 = vld [vmem:[#allocation2 + $0x34] ss:$8 sps:$4 sm:$0xff]  }
  0x21   : > { %263 = vmatprep.subr.bf16.mxu0 %v2186_v4  ;;  %536 = vmatprep.subr.bf16.mxu1 %v2186_v4  ;;  %v2214_v11 = vld [vmem:[#allocation2 + $0x30] ss:$8 sps:$4 sm:$0xff]   ;;  %v2218_v12 = vld [vmem:[#allocation2 + $0x24] ss:$8 sps:$4 sm:$0xff]   ;;  %v2222_v13 = vld [vmem:[#allocation2 + $0x20] ss:$8 sps:$4 sm:$0xff]  }
  0x22   : > { %v2226_v14 = vld [vmem:[#allocation2 + $0x14] ss:$8 sps:$4 sm:$0xff]   ;;  %v2230_v16 = vld [vmem:[#allocation2 + $0x10] ss:$8 sps:$4 sm:$0xff]   ;;  %v2234_v17 = vld [vmem:[#allocation2 + $0x4] ss:$8 sps:$4 sm:$0xff]  }
  0x23   : > { %v2238_v18 = vld [vmem:[#allocation2] ss:$8 sps:$4 sm:$0xff]   ;;  %v2242_v19 = vld [vmem:[#allocation2 + $0xf4] ss:$8 sps:$4 sm:$0xff]   ;;  %v2246_v20 = vld [vmem:[#allocation2 + $0xf0] ss:$8 sps:$4 sm:$0xff]  }
  0x24   : > { %264 = vmatpush1.bf16.msra.mxu0 %v2190_v5  ;;  %537 = vmatpush1.bf16.msra.mxu1 %v2190_v5  ;;  %v2003_v15 = vld [vmem:[#allocation7 + $0x4] ss:$8 sps:$4 sm:$0xff]   ;;  %v2250_v21 = vld [vmem:[#allocation2 + $0xe4] ss:$8 sps:$4 sm:$0xff]   ;;  %v2254_v22 = vld [vmem:[#allocation2 + $0xe0] ss:$8 sps:$4 sm:$0xff]  }
  0x25   : > { %265 = vmatprep.subr.bf16.mxu0 %v2194_v6  ;;  %538 = vmatprep.subr.bf16.mxu1 %v2194_v6  ;;  %v2258_v23 = vld [vmem:[#allocation2 + $0xd4] ss:$8 sps:$4 sm:$0xff]   ;;  %v2262_v24 = vld [vmem:[#allocation2 + $0xd0] ss:$8 sps:$4 sm:$0xff]   ;;  %v2266_v25 = vld [vmem:[#allocation2 + $0xc4] ss:$8 sps:$4 sm:$0xff]  }
  0x26   : > { %293 = vmatprep.mubr.bf16.mxu0 %v2003_v15  ;;  %v2270_v26 = vld [vmem:[#allocation2 + $0xc0] ss:$8 sps:$4 sm:$0xff]   ;;  %v2274_v27 = vld [vmem:[#allocation2 + $0xb4] ss:$8 sps:$4 sm:$0xff]   ;;  %v2278_v28 = vld [vmem:[#allocation2 + $0xb0] ss:$8 sps:$4 sm:$0xff]  }
  0x27   : > { %v2282_v29 = vld [vmem:[#allocation2 + $0xa4] ss:$8 sps:$4 sm:$0xff]   ;;  %v2286_v30 = vld [vmem:[#allocation2 + $0xa0] ss:$8 sps:$4 sm:$0xff]   ;;  %v2290_v31 = vld [vmem:[#allocation2 + $0x94] ss:$8 sps:$4 sm:$0xff]  }
  0x28   : > { %266 = vmatpush1.bf16.msra.mxu0 %v2198_v7  ;;  %539 = vmatpush1.bf16.msra.mxu1 %v2198_v7  ;;  %v2294_v32 = vld [vmem:[#allocation2 + $0x90] ss:$8 sps:$4 sm:$0xff]   ;;  %v2298_v33 = vld [vmem:[#allocation2 + $0x84] ss:$8 sps:$4 sm:$0xff]   ;;  %v2302_v34 = vld [vmem:[#allocation2 + $0x80] ss:$8 sps:$4 sm:$0xff]  }
  0x29   : > { %267 = vmatprep.subr.bf16.mxu0 %v2202_v8  ;;  %540 = vmatprep.subr.bf16.mxu1 %v2202_v8  ;;  %v2005_v35 = vld [vmem:[#allocation7] ss:$8 sps:$4 sm:$0xff]   ;;  %v2345_v36 = vld [vmem:[%s2431_s1] sm:$0xff]  ;;  %v2350_v38 = vld [vmem:[%s2431_s1 + $0x8] sm:$0xff]  ;;  %s52_s0 = sadd.s32 1, %s2137_s0  }
  0x2a   : > { %v2355_v40 = vld [vmem:[%s2431_s1 + $0x10] sm:$0xff]  ;;  %v2362_v44 = vld [vmem:[%s2431_s1 + $0x18] sm:$0xff]  ;;  %p49_p10 = scmp.ge.s32.totalorder %s52_s0, 12  }
  0x2c   : > { %268 = vmatpush1.bf16.msra.mxu0 %v2206_v9  ;;  %541 = vmatpush1.bf16.msra.mxu1 %v2206_v9 }
  0x2d   : > { %269 = vmatprep.subr.bf16.mxu0 %v2210_v10  ;;  %542 = vmatprep.subr.bf16.mxu1 %v2210_v10 }
  0x30   : > { %270 = vmatpush1.bf16.msra.mxu0 %v2214_v11  ;;  %543 = vmatpush1.bf16.msra.mxu1 %v2214_v11 }
  0x31   : > { %271 = vmatprep.subr.bf16.mxu0 %v2218_v12  ;;  %544 = vmatprep.subr.bf16.mxu1 %v2218_v12 }
  0x34   : > { %272 = vmatpush1.bf16.msra.mxu0 %v2222_v13  ;;  %545 = vmatpush1.bf16.msra.mxu1 %v2222_v13 }
  0x35   : > { %273 = vmatprep.subr.bf16.mxu0 %v2226_v14  ;;  %546 = vmatprep.subr.bf16.mxu1 %v2226_v14 }
  0x38   : > { %274 = vmatpush1.bf16.msra.mxu0 %v2230_v16  ;;  %547 = vmatpush1.bf16.msra.mxu1 %v2230_v16 }
  0x39   : > { %275 = vmatprep.subr.bf16.mxu0 %v2234_v17  ;;  %548 = vmatprep.subr.bf16.mxu1 %v2234_v17 }
  0x3c   : > { %276 = vmatpush1.bf16.msra.mxu0 %v2238_v18  ;;  %549 = vmatpush1.bf16.msra.mxu1 %v2238_v18 }
  0x3d   : > { %277 = vmatprep.subr.bf16.mxu0 %v2242_v19  ;;  %550 = vmatprep.subr.bf16.mxu1 %v2242_v19 }
  0x40   : > { %278 = vmatpush2.bf16.msra.mxu0 %v2246_v20  ;;  %551 = vmatpush2.bf16.msra.mxu1 %v2246_v20 }
  0x41   : > { %279 = vmatprep.subr.bf16.mxu0 %v2250_v21  ;;  %552 = vmatprep.subr.bf16.mxu1 %v2250_v21 }
  0x44   : > { %280 = vmatpush2.bf16.msra.mxu0 %v2254_v22  ;;  %553 = vmatpush2.bf16.msra.mxu1 %v2254_v22 }
  0x45   : > { %281 = vmatprep.subr.bf16.mxu0 %v2258_v23  ;;  %554 = vmatprep.subr.bf16.mxu1 %v2258_v23 }
  0x48   : > { %282 = vmatpush2.bf16.msra.mxu0 %v2262_v24  ;;  %555 = vmatpush2.bf16.msra.mxu1 %v2262_v24 }
  0x49   : > { %283 = vmatprep.subr.bf16.mxu0 %v2266_v25  ;;  %556 = vmatprep.subr.bf16.mxu1 %v2266_v25 }
  0x4c   : > { %284 = vmatpush2.bf16.msra.mxu0 %v2270_v26  ;;  %557 = vmatpush2.bf16.msra.mxu1 %v2270_v26 }
  0x4d   : > { %285 = vmatprep.subr.bf16.mxu0 %v2274_v27  ;;  %558 = vmatprep.subr.bf16.mxu1 %v2274_v27 }
  0x50   : > { %286 = vmatpush2.bf16.msra.mxu0 %v2278_v28  ;;  %559 = vmatpush2.bf16.msra.mxu1 %v2278_v28 }
  0x51   : > { %287 = vmatprep.subr.bf16.mxu0 %v2282_v29  ;;  %560 = vmatprep.subr.bf16.mxu1 %v2282_v29 }
  0x54   : > { %288 = vmatpush2.bf16.msra.mxu0 %v2286_v30  ;;  %561 = vmatpush2.bf16.msra.mxu1 %v2286_v30 }
  0x55   : > { %289 = vmatprep.subr.bf16.mxu0 %v2290_v31  ;;  %562 = vmatprep.subr.bf16.mxu1 %v2290_v31 }
  0x58   : > { %290 = vmatpush2.bf16.msra.mxu0 %v2294_v32  ;;  %563 = vmatpush2.bf16.msra.mxu1 %v2294_v32 }
  0x59   : > { %291 = vmatprep.subr.bf16.mxu0 %v2298_v33  ;;  %564 = vmatprep.subr.bf16.mxu1 %v2298_v33 }
  0x5c   : > { %292 = vmatpush2.bf16.msra.mxu0 %v2302_v34  ;;  %565 = vmatpush2.bf16.msra.mxu1 %v2302_v34 }
  0x5d   : > { %807 = vmatprep.subr.bf16.mxu0 %v2181_v2  ;;  %1080 = vmatprep.subr.bf16.mxu1 %v2181_v2 }
  0x5f   : > { %294 = vmatmul.mubr.bf16.vlgmr.msra.gmra.mxu0 %v2005_v35 }
  0x60   : > { %808 = vmatpush1.bf16.msra.mxu0 %v2183_v3 }
  0x61   : > { %809 = vmatprep.subr.bf16.mxu0 %v2186_v4 }
  0x64   : > { %810 = vmatpush1.bf16.msra.mxu0 %v2190_v5 }
  0x65   : > { %811 = vmatprep.subr.bf16.mxu0 %v2194_v6 }
  0x68   : > { %812 = vmatpush1.bf16.msra.mxu0 %v2198_v7 }
  0x69   : > { %813 = vmatprep.subr.bf16.mxu0 %v2202_v8 }
  0x6c   : > { %814 = vmatpush1.bf16.msra.mxu0 %v2206_v9 }
  0x6d   : > { %815 = vmatprep.subr.bf16.mxu0 %v2210_v10 }
  0x70   : > { %816 = vmatpush1.bf16.msra.mxu0 %v2214_v11 }
  0x71   : > { %817 = vmatprep.subr.bf16.mxu0 %v2218_v12 }
  0x74   : > { %818 = vmatpush1.bf16.msra.mxu0 %v2222_v13 }
  0x75   : > { %819 = vmatprep.subr.bf16.mxu0 %v2226_v14 }
  0x78   : > { %820 = vmatpush1.bf16.msra.mxu0 %v2230_v16 }
  0x79   : > { %821 = vmatprep.subr.bf16.mxu0 %v2234_v17 }
  0x7c   : > { %822 = vmatpush1.bf16.msra.mxu0 %v2238_v18 }
  0x7d   : > { %823 = vmatprep.subr.bf16.mxu0 %v2242_v19 }
  0x80   : > { %824 = vmatpush2.bf16.msra.mxu0 %v2246_v20 }
  0x81   : > { %825 = vmatprep.subr.bf16.mxu0 %v2250_v21 }
  0x84   : > { %826 = vmatpush2.bf16.msra.mxu0 %v2254_v22 }
  0x85   : > { %827 = vmatprep.subr.bf16.mxu0 %v2258_v23 }
  0x88   : > { %828 = vmatpush2.bf16.msra.mxu0 %v2262_v24 }
  0x89   : > { %829 = vmatprep.subr.bf16.mxu0 %v2266_v25 }
  0x8c   : > { %830 = vmatpush2.bf16.msra.mxu0 %v2270_v26 }
  0x8d   : > { %831 = vmatprep.subr.bf16.mxu0 %v2274_v27 }
  0x90   : > { %832 = vmatpush2.bf16.msra.mxu0 %v2278_v28 }
  0x91   : > { %833 = vmatprep.subr.bf16.mxu0 %v2282_v29 }
  0x94   : > { %834 = vmatpush2.bf16.msra.mxu0 %v2286_v30 }
  0x95   : > { %835 = vmatprep.subr.bf16.mxu0 %v2290_v31 }
  0x98   : > { %836 = vmatpush2.bf16.msra.mxu0 %v2294_v32 }
  0x99   : > { %837 = vmatprep.subr.bf16.mxu0 %v2298_v33 }
  0x9c   : > { %838 = vmatpush2.bf16.msra.mxu0 %v2302_v34 }
 0x11f   : > { %v295_v37 = vpop.f32.mrf.mxu0 }
 0x120   : > { %v296_v41 = vadd.f32 %v295_v37, %v2345_v36 }
 0x121   : > { %v297_v39 = vpop.f32.mrf.mxu0 }
 0x122   : > { %v298_v42 = vadd.f32 %v297_v39, %v2350_v38  ;;  %v304_v48 = vmax.f32 %v296_v41, 0.0 }
 0x123   : > { %v299_v43 = vpop.f32.mrf.mxu0 }
 0x124   : > { %v305_v45 = vmax.f32 %v298_v42, 0.0  ;;  %v300_v46 = vadd.f32 %v299_v43, %v2355_v40  ;;  %v308_v53 = vmin.f32 %v304_v48, 1.0 }
 0x125   : > { %v301_v47 = vpop.f32.mrf.mxu0 }
 0x126   : > { %v306_v49 = vmax.f32 %v300_v46, 0.0  ;;  %v302_v50 = vadd.f32 %v301_v47, %v2362_v44  ;;  %v309_v51 = vmin.f32 %v305_v45, 1.0 }
 0x128   : > { %v307_v52 = vmax.f32 %v302_v50, 0.0  ;;  %v310_v54 = vmin.f32 %v306_v49, 1.0 }
 0x12a   : > { %v311_v55 = vmin.f32 %v307_v52, 1.0  ;;  %v2058_v57 = vpack.c.bf16 %v310_v54, %v308_v53  ;;  %v2012_v52 = vld [vmem:[#allocation2 + $0x54] ss:$8 sps:$4 sm:$0xff] (%p49_p10)   ;;  %v2014_v53 = vld [vmem:[#allocation2 + $0x50] ss:$8 sps:$4 sm:$0xff] (%p49_p10)  }
 0x12b   :  { %v2015_v54 = vld [vmem:[#allocation2 + $0x44] ss:$8 sps:$4 sm:$0xff] (%p49_p10)  }
 0x12c   : > { %v2057_v56 = vpack.c.bf16 %v311_v55, %v309_v51  ;;  %v2009_v51 = vld [vmem:[#allocation2 + $0x64] ss:$8 sps:$4 sm:$0xff] (%p49_p10)   ;;  %v2017_v55 = vld [vmem:[#allocation2 + $0x40] ss:$8 sps:$4 sm:$0xff] (%p49_p10)  }
 0x12e   : > { %566 = vmatprep.mubr.bf16.mxu1 %v2057_v56  ;;  %v2018_v56 = vld [vmem:[#allocation2 + $0x34] ss:$8 sps:$4 sm:$0xff] (%p49_p10)  }
 0x12f   : > { %567 = vmatmul.mubr.bf16.vlgmr.msra.gmra.mxu1 %v2058_v57  ;;  %v2020_v57 = vld [vmem:[#allocation2 + $0x30] ss:$8 sps:$4 sm:$0xff] (%p49_p10)  }
 0x130   : > { %1081 = vmatpush1.bf16.msra.mxu1 %v2183_v3 }
 0x131   : > { %1082 = vmatprep.subr.bf16.mxu1 %v2186_v4 }
 0x134   : > { %1083 = vmatpush1.bf16.msra.mxu1 %v2190_v5 }
 0x135   : > { %1084 = vmatprep.subr.bf16.mxu1 %v2194_v6 }
 0x138   : > { %1085 = vmatpush1.bf16.msra.mxu1 %v2198_v7 }
 0x139   : > { %1086 = vmatprep.subr.bf16.mxu1 %v2202_v8 }
 0x13c   : > { %1087 = vmatpush1.bf16.msra.mxu1 %v2206_v9 }
 0x13d   : > { %1088 = vmatprep.subr.bf16.mxu1 %v2210_v10 }
 0x140   : > { %1089 = vmatpush1.bf16.msra.mxu1 %v2214_v11 }
 0x141   : > { %1090 = vmatprep.subr.bf16.mxu1 %v2218_v12 }
 0x144   : > { %1091 = vmatpush1.bf16.msra.mxu1 %v2222_v13 }
 0x145   : > { %1092 = vmatprep.subr.bf16.mxu1 %v2226_v14 }
 0x148   : > { %1093 = vmatpush1.bf16.msra.mxu1 %v2230_v16 }
 0x149   : > { %1094 = vmatprep.subr.bf16.mxu1 %v2234_v17 }
 0x14c   : > { %1095 = vmatpush1.bf16.msra.mxu1 %v2238_v18 }
 0x14d   : > { %1096 = vmatprep.subr.bf16.mxu1 %v2242_v19 }
 0x150   : > { %1097 = vmatpush2.bf16.msra.mxu1 %v2246_v20 }
 0x151   : > { %1098 = vmatprep.subr.bf16.mxu1 %v2250_v21 }
 0x154   : > { %1099 = vmatpush2.bf16.msra.mxu1 %v2254_v22 }
 0x155   : > { %1100 = vmatprep.subr.bf16.mxu1 %v2258_v23 }
 0x158   : > { %1101 = vmatpush2.bf16.msra.mxu1 %v2262_v24 }
 0x159   : > { %1102 = vmatprep.subr.bf16.mxu1 %v2266_v25 }
 0x15c   : > { %1103 = vmatpush2.bf16.msra.mxu1 %v2270_v26 }
 0x15d   : > { %1104 = vmatprep.subr.bf16.mxu1 %v2274_v27 }
 0x160   : > { %1105 = vmatpush2.bf16.msra.mxu1 %v2278_v28 }
 0x161   : > { %1106 = vmatprep.subr.bf16.mxu1 %v2282_v29 }
 0x164   : > { %1107 = vmatpush2.bf16.msra.mxu1 %v2286_v30 }
 0x165   : > { %1108 = vmatprep.subr.bf16.mxu1 %v2290_v31 }
 0x168   : > { %1109 = vmatpush2.bf16.msra.mxu1 %v2294_v32 }
 0x169   : > { %1110 = vmatprep.subr.bf16.mxu1 %v2298_v33 }
 0x16c   : > { %1111 = vmatpush2.bf16.msra.mxu1 %v2302_v34 }
 0x1ef   : > { %v568_v58 = vpop.f32.mrf.mxu1 }
 0x1f0   : > { %v569_v60 = vadd.f32 %v568_v58, %v2345_v36  ;;  %v2021_v58 = vld [vmem:[#allocation2 + $0x24] ss:$8 sps:$4 sm:$0xff] (%p49_p10)  }
 0x1f1   : > { %v570_v59 = vpop.f32.mrf.mxu1 }
 0x1f2   : > { %v571_v61 = vadd.f32 %v570_v59, %v2350_v38  ;;  %v577_v2 = vmax.f32 %v569_v60, 0.0  ;;  %v2023_v59 = vld [vmem:[#allocation2 + $0x20] ss:$8 sps:$4 sm:$0xff] (%p49_p10)   ;;  %v2024_v60 = vld [vmem:[#allocation2 + $0x14] ss:$8 sps:$4 sm:$0xff] (%p49_p10)  }
 0x1f3   : > { %v572_v62 = vpop.f32.mrf.mxu1 }
 0x1f4   : > { %v578_v63 = vmax.f32 %v571_v61, 0.0  ;;  %v573_v0 = vadd.f32 %v572_v62, %v2355_v40  ;;  %v581_v7 = vmin.f32 %v577_v2, 1.0  ;;  %v2026_v62 = vld [vmem:[#allocation2 + $0x10] ss:$8 sps:$4 sm:$0xff] (%p49_p10)  }
 0x1f5   : > { %v574_v1 = vpop.f32.mrf.mxu1  ;;  %v2032_v2 = vld [vmem:[#allocation2 + $0xf0] ss:$8 sps:$4 sm:$0xff] (%p49_p10)  }
 0x1f6   : > { %v579_v3 = vmax.f32 %v573_v0, 0.0  ;;  %v575_v4 = vadd.f32 %v574_v1, %v2362_v44  ;;  %v582_v5 = vmin.f32 %v578_v63, 1.0  ;;  %v2027_v63 = vld [vmem:[#allocation2 + $0x4] ss:$8 sps:$4 sm:$0xff] (%p49_p10)   ;;  %v2029_v0 = vld [vmem:[#allocation2] ss:$8 sps:$4 sm:$0xff] (%p49_p10)  }
 0x1f7   :  { %v2030_v1 = vld [vmem:[#allocation2 + $0xf4] ss:$8 sps:$4 sm:$0xff] (%p49_p10)  }
 0x1f8   : > { %v580_v6 = vmax.f32 %v575_v4, 0.0  ;;  %v583_v8 = vmin.f32 %v579_v3, 1.0  ;;  %v2033_v3 = vld [vmem:[#allocation2 + $0xe4] ss:$8 sps:$4 sm:$0xff] (%p49_p10)   ;;  %v2035_v4 = vld [vmem:[#allocation2 + $0xe0] ss:$8 sps:$4 sm:$0xff] (%p49_p10)  }
 0x1fa   : > { %v584_v9 = vmin.f32 %v580_v6, 1.0  ;;  %v2060_v11 = vpack.c.bf16 %v583_v8, %v581_v7  ;;  %v2038_v6 = vld [vmem:[#allocation2 + $0xd0] ss:$8 sps:$4 sm:$0xff] (%p49_p10)   ;;  %v2039_v7 = vld [vmem:[#allocation2 + $0xc4] ss:$8 sps:$4 sm:$0xff] (%p49_p10)  }
 0x1fb   :  { %v2041_v8 = vld [vmem:[#allocation2 + $0xc0] ss:$8 sps:$4 sm:$0xff] (%p49_p10)  }
 0x1fc   : > { %v2059_v10 = vpack.c.bf16 %v584_v9, %v582_v5  ;;  %v2036_v5 = vld [vmem:[#allocation2 + $0xd4] ss:$8 sps:$4 sm:$0xff] (%p49_p10)  }
 0x1fd   :  { %v2042_v9 = vld [vmem:[#allocation2 + $0xb4] ss:$8 sps:$4 sm:$0xff] (%p49_p10)  }
 0x1fe   : > { %839 = vmatprep.mubr.bf16.mxu0 %v2059_v10  ;;  %v2044_v10 = vld [vmem:[#allocation2 + $0xb0] ss:$8 sps:$4 sm:$0xff] (%p49_p10)  }
 0x1ff   : > { %840 = vmatmul.mubr.bf16.vlgmr.msra.gmra.mxu0 %v2060_v11  ;;  %v2045_v11 = vld [vmem:[#allocation2 + $0xa4] ss:$8 sps:$4 sm:$0xff] (%p49_p10)  }
 0x2bf   : > { %v841_v12 = vpop.f32.mrf.mxu0 }
 0x2c0   : > { %v842_v14 = vadd.f32 %v841_v12, %v2345_v36  ;;  %v2047_v12 = vld [vmem:[#allocation2 + $0xa0] ss:$8 sps:$4 sm:$0xff] (%p49_p10)  }
 0x2c1   : > { %v843_v13 = vpop.f32.mrf.mxu0 }
 0x2c2   : > { %v844_v15 = vadd.f32 %v843_v13, %v2350_v38  ;;  %v850_v20 = vmax.f32 %v842_v14, 0.0  ;;  %v2048_v13 = vld [vmem:[#allocation2 + $0x94] ss:$8 sps:$4 sm:$0xff] (%p49_p10)   ;;  %v2050_v14 = vld [vmem:[#allocation2 + $0x90] ss:$8 sps:$4 sm:$0xff] (%p49_p10)  }
 0x2c3   : > { %v845_v16 = vpop.f32.mrf.mxu0 }
 0x2c4   : > { %v851_v17 = vmax.f32 %v844_v15, 0.0  ;;  %v846_v18 = vadd.f32 %v845_v16, %v2355_v40  ;;  %v854_v25 = vmin.f32 %v850_v20, 1.0  ;;  %v2051_v15 = vld [vmem:[#allocation2 + $0x84] ss:$8 sps:$4 sm:$0xff] (%p49_p10)   ;;  %v2053_v16 = vld [vmem:[#allocation2 + $0x80] ss:$8 sps:$4 sm:$0xff] (%p49_p10)  }
 0x2c5   : > { %v847_v19 = vpop.f32.mrf.mxu0  ;;  %v1180_v20 = vld [vmem:[%s2431_s1 + $0x8] sm:$0xff] (%p49_p10) }
 0x2c6   : > { %v852_v21 = vmax.f32 %v846_v18, 0.0  ;;  %v848_v22 = vadd.f32 %v847_v19, %v2362_v44  ;;  %v855_v23 = vmin.f32 %v851_v17, 1.0  ;;  %v1179_v18 = vld [vmem:[%s2431_s1] sm:$0xff] (%p49_p10) }
 0x2c8   : > { %v853_v24 = vmax.f32 %v848_v22, 0.0  ;;  %v856_v26 = vmin.f32 %v852_v21, 1.0  ;;  %v1181_v22 = vld [vmem:[%s2431_s1 + $0x10] sm:$0xff] (%p49_p10) }
 0x2ca   : > { %v857_v27 = vmin.f32 %v853_v24, 1.0  ;;  %v2062_v29 = vpack.c.bf16 %v856_v26, %v854_v25  ;;  %v1182_v26 = vld [vmem:[%s2431_s1 + $0x18] sm:$0xff] (%p49_p10)  ;;  %s2143_s1 = smov (%p49_p10), [#allocation7]  }
 0x2cb   :  { %s1696_s12 = sshll.u32 (%p49_p10), %s2143_s1, 4  ;;  %s1697_s12 = int_to_ptr.vmem [resolvable:$true] %s1696_s12 }
 0x2cc   : > { %v2061_v28 = vpack.c.bf16 %v857_v27, %v855_v23  ;;  %s2105_s13 = scalar_lea.vmem (%p49_p10), %s1697_s12, 256  ;;  %p2110_p12 = scmp.lt.s32.totalorder (%p49_p10), %s1697_s12, %s1697_s12 }
 0x2cd   :  { %p2106_p11 = scmp.ne.s32.totalorder (%p49_p10), %s1697_s12, %s2105_s13  ;;  %p2111_p13 = scmp.lt.s32.totalorder (%p49_p10), %s2105_s13, %s2105_s13 }
 0x2ce   : > { %1112 = vmatprep.mubr.bf16.mxu1 %v2061_v28 }
 0x2cf   : > { %1113 = vmatmul.mubr.bf16.vlgmr.msra.gmra.mxu1 %v2062_v29  ;;  %p2112_p0 = por (%p49_p10), %p2111_p13, %p2110_p12 }
 0x2d1   :  { %p2113_p1 = pnand (%p49_p10), %p2112_p0, %p2106_p11 }
 0x38f   : > { %v1114_v30 = vpop.f32.mrf.mxu1 }
 0x390   : > { %v1115_v31 = vadd.f32 %v1114_v30, %v2345_v36 }
 0x391   : > { %v1116_v32 = vpop.f32.mrf.mxu1 }
 0x392   : > { %v1123_v33 = vmax.f32 %v1115_v31, 0.0  ;;  %v1117_v34 = vadd.f32 %v1116_v32, %v2350_v38  ;;  %v2006_v38 = vld [vmem:[#allocation2 + $0x74] ss:$8 sps:$4 sm:$0xff] (%p49_p10)  }
 0x393   : > { %v1118_v35 = vpop.f32.mrf.mxu1  ;;  %1353 = vmatprep.subr.bf16.mxu0 (%p49_p10), %v2006_v38  ;;  %1626 = vmatprep.subr.bf16.mxu1 (%p49_p10), %v2006_v38 }
 0x394   : > { %v1124_v37 = vmax.f32 %v1117_v34, 0.0  ;;  %v1119_v39 = vadd.f32 %v1118_v35, %v2355_v40  ;;  %v1127_v42 = vmin.f32 %v1123_v33, 1.0  ;;  %v2008_v40 = vld [vmem:[#allocation2 + $0x70] ss:$8 sps:$4 sm:$0xff] (%p49_p10)  }
 0x395   : > { %v1120_v41 = vpop.f32.mrf.mxu1  ;;  %1354 = vmatpush1.bf16.msra.mxu0 (%p49_p10), %v2008_v40  ;;  %1627 = vmatpush1.bf16.msra.mxu1 (%p49_p10), %v2008_v40 }
 0x396   : > { %v1128_v43 = vmin.f32 %v1124_v37, 1.0  ;;  %v1125_v45 = vmax.f32 %v1119_v39, 0.0  ;;  %v1121_v46 = vadd.f32 %v1120_v41, %v2362_v44  ;;  %v2011_v44 = vld [vmem:[#allocation2 + $0x60] ss:$8 sps:$4 sm:$0xff] (%p49_p10)   ;;  %1355 = vmatprep.subr.bf16.mxu0 (%p49_p10), %v2009_v51  ;;  %1628 = vmatprep.subr.bf16.mxu1 (%p49_p10), %v2009_v51 }
 0x398   : > { %v1936_v47 = vpack.c.bf16 %v1128_v43, %v1127_v42  ;;  %v1126_v48 = vmax.f32 %v1121_v46, 0.0  ;;  %v1129_v49 = vmin.f32 %v1125_v45, 1.0 }
 0x399   :  { %1356 = vmatpush1.bf16.msra.mxu0 (%p49_p10), %v2011_v44  ;;  %1629 = vmatpush1.bf16.msra.mxu1 (%p49_p10), %v2011_v44 }
 0x39a   : > { %1143 = vst [vmem:[#allocation7] sm:$0xff] %v1936_v47  ;;  %v1130_v50 = vmin.f32 %v1126_v48, 1.0  ;;  %51 = sbr.rel (!%p49_p10) target bundleno = 30 (0x1e), region = 47  ;;  %1357 = vmatprep.subr.bf16.mxu0 (%p49_p10), %v2012_v52  ;;  %1630 = vmatprep.subr.bf16.mxu1 (%p49_p10), %v2012_v52 }
 0x39c   : > { %v1937_v36 = vpack.c.bf16 %v1130_v50, %v1129_v49 }
 0x39d   :  { %1358 = vmatpush1.bf16.msra.mxu0 (%p49_p10), %v2014_v53  ;;  %1631 = vmatpush1.bf16.msra.mxu1 (%p49_p10), %v2014_v53 }
 0x39e   : > { %1144 = vst [vmem:[#allocation7 + $0x8] sm:$0xff] %v1937_v36  ;;  %1359 = vmatprep.subr.bf16.mxu0 (%p49_p10), %v2015_v54  ;;  %1632 = vmatprep.subr.bf16.mxu1 (%p49_p10), %v2015_v54 }
 0x3a1   :  { %1360 = vmatpush1.bf16.msra.mxu0 %v2017_v55  ;;  %1633 = vmatpush1.bf16.msra.mxu1 %v2017_v55 }
 0x3a2   :  { %1361 = vmatprep.subr.bf16.mxu0 %v2018_v56  ;;  %1634 = vmatprep.subr.bf16.mxu1 %v2018_v56 }
 0x3a5   :  { %1362 = vmatpush1.bf16.msra.mxu0 %v2020_v57  ;;  %1635 = vmatpush1.bf16.msra.mxu1 %v2020_v57  ;;  %v2054_v61 = vld [vmem:[#allocation7 + $0x4] ss:$8 sps:$4 sm:$0xff]   ;;  %v2056_v17 = vld [vmem:[#allocation7] ss:$8 sps:$4 sm:$0xff]  }
 0x3a6   :  { %1363 = vmatprep.subr.bf16.mxu0 %v2021_v58  ;;  %1636 = vmatprep.subr.bf16.mxu1 %v2021_v58 }
 0x3a7   :  { %1385 = vmatprep.mubr.bf16.mxu0 %v2054_v61 }
 0x3a9   :  { %1364 = vmatpush1.bf16.msra.mxu0 %v2023_v59  ;;  %1637 = vmatpush1.bf16.msra.mxu1 %v2023_v59 }
 0x3aa   :  { %1365 = vmatprep.subr.bf16.mxu0 %v2024_v60  ;;  %1638 = vmatprep.subr.bf16.mxu1 %v2024_v60 }
 0x3ad   :  { %1366 = vmatpush1.bf16.msra.mxu0 %v2026_v62  ;;  %1639 = vmatpush1.bf16.msra.mxu1 %v2026_v62 }
 0x3ae   :  { %1367 = vmatprep.subr.bf16.mxu0 %v2027_v63  ;;  %1640 = vmatprep.subr.bf16.mxu1 %v2027_v63 }
 0x3b1   :  { %1368 = vmatpush1.bf16.msra.mxu0 %v2029_v0  ;;  %1641 = vmatpush1.bf16.msra.mxu1 %v2029_v0 }
 0x3b2   :  { %1369 = vmatprep.subr.bf16.mxu0 %v2030_v1  ;;  %1642 = vmatprep.subr.bf16.mxu1 %v2030_v1 }
 0x3b5   :  { %1370 = vmatpush2.bf16.msra.mxu0 %v2032_v2  ;;  %1643 = vmatpush2.bf16.msra.mxu1 %v2032_v2 }
 0x3b6   :  { %1371 = vmatprep.subr.bf16.mxu0 %v2033_v3  ;;  %1644 = vmatprep.subr.bf16.mxu1 %v2033_v3 }
 0x3b9   :  { %1372 = vmatpush2.bf16.msra.mxu0 %v2035_v4  ;;  %1645 = vmatpush2.bf16.msra.mxu1 %v2035_v4 }
 0x3ba   :  { %1373 = vmatprep.subr.bf16.mxu0 %v2036_v5  ;;  %1646 = vmatprep.subr.bf16.mxu1 %v2036_v5 }
 0x3bd   :  { %1374 = vmatpush2.bf16.msra.mxu0 %v2038_v6  ;;  %1647 = vmatpush2.bf16.msra.mxu1 %v2038_v6 }
 0x3be   :  { %1375 = vmatprep.subr.bf16.mxu0 %v2039_v7  ;;  %1648 = vmatprep.subr.bf16.mxu1 %v2039_v7 }
 0x3c1   :  { %1376 = vmatpush2.bf16.msra.mxu0 %v2041_v8  ;;  %1649 = vmatpush2.bf16.msra.mxu1 %v2041_v8 }
 0x3c2   :  { %1377 = vmatprep.subr.bf16.mxu0 %v2042_v9  ;;  %1650 = vmatprep.subr.bf16.mxu1 %v2042_v9 }
 0x3c5   :  { %1378 = vmatpush2.bf16.msra.mxu0 %v2044_v10  ;;  %1651 = vmatpush2.bf16.msra.mxu1 %v2044_v10 }
 0x3c6   :  { %1379 = vmatprep.subr.bf16.mxu0 %v2045_v11  ;;  %1652 = vmatprep.subr.bf16.mxu1 %v2045_v11 }
 0x3c9   :  { %1380 = vmatpush2.bf16.msra.mxu0 %v2047_v12  ;;  %1653 = vmatpush2.bf16.msra.mxu1 %v2047_v12 }
 0x3ca   :  { %1381 = vmatprep.subr.bf16.mxu0 %v2048_v13  ;;  %1654 = vmatprep.subr.bf16.mxu1 %v2048_v13 }
 0x3cd   :  { %1382 = vmatpush2.bf16.msra.mxu0 %v2050_v14  ;;  %1655 = vmatpush2.bf16.msra.mxu1 %v2050_v14 }
 0x3ce   :  { %1383 = vmatprep.subr.bf16.mxu0 %v2051_v15  ;;  %1656 = vmatprep.subr.bf16.mxu1 %v2051_v15 }
 0x3d1   :  { %1384 = vmatpush2.bf16.msra.mxu0 %v2053_v16  ;;  %1657 = vmatpush2.bf16.msra.mxu1 %v2053_v16 }
 0x3d4   :  { %1386 = vmatmul.mubr.bf16.vlgmr.msra.gmra.mxu0 %v2056_v17 }
 0x494   :  { %v1387_v19 = vpop.f32.mrf.mxu0 }
 0x495   :  { %v1388_v23 = vadd.f32 %v1387_v19, %v1179_v18 }
 0x496   :  { %v1389_v21 = vpop.f32.mrf.mxu0 }
 0x497   :  { %v1390_v24 = vadd.f32 %v1389_v21, %v1180_v20  ;;  %v1396_v30 = vmax.f32 %v1388_v23, 0.0 }
 0x498   :  { %v1391_v25 = vpop.f32.mrf.mxu0 }
 0x499   :  { %v1397_v27 = vmax.f32 %v1390_v24, 0.0  ;;  %v1392_v28 = vadd.f32 %v1391_v25, %v1181_v22  ;;  %v1400_v35 = vmin.f32 %v1396_v30, 1.0 }
 0x49a   :  { %v1393_v29 = vpop.f32.mrf.mxu0 }
 0x49b   :  { %v1398_v31 = vmax.f32 %v1392_v28, 0.0  ;;  %v1394_v32 = vadd.f32 %v1393_v29, %v1182_v26  ;;  %v1401_v33 = vmin.f32 %v1397_v27, 1.0 }
 0x49d   :  { %v1399_v34 = vmax.f32 %v1394_v32, 0.0  ;;  %v1402_v37 = vmin.f32 %v1398_v31, 1.0 }
 0x49f   :  { %v1403_v39 = vmin.f32 %v1399_v34, 1.0  ;;  %v2064_v42 = vpack.c.bf16 %v1402_v37, %v1400_v35 }
 0x4a1   :  { %v2063_v41 = vpack.c.bf16 %v1403_v39, %v1401_v33 }
 0x4a3   :  { %1658 = vmatprep.mubr.bf16.mxu1 %v2063_v41 }
 0x4a4   :  { %1659 = vmatmul.mubr.bf16.vlgmr.msra.gmra.mxu1 %v2064_v42 }
 0x564   :  { %v1660_v43 = vpop.f32.mrf.mxu1 }
 0x565   :  { %v1661_v45 = vadd.f32 %v1660_v43, %v1179_v18 }
 0x566   :  { %v1662_v46 = vpop.f32.mrf.mxu1 }
 0x567   :  { %v1669_v47 = vmax.f32 %v1661_v45, 0.0  ;;  %v1663_v48 = vadd.f32 %v1662_v46, %v1180_v20 }
 0x568   :  { %v1664_v49 = vpop.f32.mrf.mxu1 }
 0x569   :  { %v1670_v50 = vmax.f32 %v1663_v48, 0.0  ;;  %v1665_v36 = vadd.f32 %v1664_v49, %v1181_v22  ;;  %v1673_v40 = vmin.f32 %v1669_v47, 1.0 }
 0x56a   :  { %v1666_v38 = vpop.f32.mrf.mxu1 }
 0x56b   :  { %v1674_v51 = vmin.f32 %v1670_v50, 1.0  ;;  %v1671_v44 = vmax.f32 %v1665_v36, 0.0  ;;  %v1667_v52 = vadd.f32 %v1666_v38, %v1182_v26 }
 0x56d   :  { %v1940_v53 = vpack.c.bf16 %v1674_v51, %v1673_v40  ;;  %v1672_v54 = vmax.f32 %v1667_v52, 0.0  ;;  %v1675_v55 = vmin.f32 %v1671_v44, 1.0 }
 0x56f   :  { %1689 = vst [vmem:[#allocation7] sm:$0xff] %v1940_v53  ;;  %v1676_v56 = vmin.f32 %v1672_v54, 1.0 }
 0x571   :  { %v1941_v57 = vpack.c.bf16 %v1676_v56, %v1675_v55 }
 0x573   :  { %1690 = vst [vmem:[#allocation7 + $0x8] sm:$0xff] %v1941_v57 }
 0x574   :  { %2116 = shalt.err (!%p2113_p1)
}
 0x575   :  { %1702 = dma.vmem_to_hbm [thread:$0]  %s1697_s12, 256, %s2433_s3, [#allocation4], %s2140_s15, %s2140_s15, %s2141_s16  }
 0x576   :  { %2133 = dma.done.wait [#allocation4], 256  }
 0x577   :  { %2134 = vsyncadd [#allocation4], 4294967040 }
 0x578   :  { %1706 = vsyncpa [#allocation3], 1 }
 0x579   :  { %1707 = vsyncpa [#allocation6], 1 }
 0x57a   :  { %1708 = vsyncpa [#allocation4], 1 }

</bundles_post_ra>
